<compile_context>
chip_gen: v7x
topology: tpu7x:2x2x1
jax: 0.10.0
libtpu: 0.0.40
codegen_flags: <defaults>
</compile_context>

<pallas_src>
import jax
import jax.numpy as jnp
from jax.experimental import pallas as pl
from jax.experimental.pallas import tpu as pltpu


def _round_up(n, m):
    return ((n + m - 1) // m) * m


def mlp_kernel(x_ref, w1_ref, b1_ref, w2_ref, b2_ref, w3_ref, b3_ref, o_ref):
    # Feature-major layout: x is (10, TB), weights are (out, in), biases (out, 1).
    # Whole MLP fused: (W@X + b, ReLU) x2 + final W@X + b. Accumulation in f32 on MXU.
    x = x_ref[...]                                                                     # (10, TB)
    h1 = jnp.dot(w1_ref[...], x, preferred_element_type=jnp.float32) + b1_ref[...]    # (50, TB)
    h1 = jnp.maximum(h1, 0.0)
    h2 = jnp.dot(w2_ref[...], h1, preferred_element_type=jnp.float32) + b2_ref[...]   # (20, TB)
    h2 = jnp.maximum(h2, 0.0)
    # Final layer (1,20)@(20,TB): result stays lane-dense in this layout.
    out = jnp.dot(w3_ref[...], h2, preferred_element_type=jnp.float32) + b3_ref[...]  # (1, TB)
    o_ref[...] = out.astype(o_ref.dtype)


def test_model_forward(x, params, *, max_tile_b=1024):
    """x: (batch, 10) float32.  params: weights as (out, in), biases as (out, 1).
    Returns (batch, 1) float32 — identical semantics to TestModel.forward."""
    w1, b1, w2, b2, w3, b3 = params
    batch, fin = x.shape

    # Batch tile: lane-aligned (multiple of 128), capped so intermediates stay tiny.
    tb = min(max_tile_b, _round_up(batch, 128))
    padded = _round_up(batch, tb)

    # Transpose once outside the kernel and zero-pad batch up to a tile multiple.
    xt = jnp.pad(x.T, ((0, 0), (0, padded - batch)))                                  # (10, padded)

    grid = (padded // tb,)
    const = lambda i: (0, 0)  # weights/biases: same block every step -> stay resident in VMEM

    out_t = pl.pallas_call(
        mlp_kernel,
        out_shape=jax.ShapeDtypeStruct((1, padded), jnp.float32),
        grid=grid,
        in_specs=[
            pl.BlockSpec((fin, tb), lambda i: (0, i)),       # x tile, pipelined over batch
            pl.BlockSpec((50, 10), const),                   # W1
            pl.BlockSpec((50, 1), const),                    # b1
            pl.BlockSpec((20, 50), const),                   # W2
            pl.BlockSpec((20, 1), const),                    # b2
            pl.BlockSpec((1, 20), const),                    # W3
            pl.BlockSpec((1, 1), const),                     # b3
        ],
        out_specs=pl.BlockSpec((1, tb), lambda i: (0, i)),   # lane-dense (1, TB) output
        compiler_params=pltpu.CompilerParams(
            dimension_semantics=("parallel",),               # megacore-shard batch on v7x
            vmem_limit_bytes=32 * 1024 * 1024,               # safe on v5e / v6e / v7x
        ),
    )(xt, w1, b1, w2, b2, w3, b3)

    return out_t[:, :batch].T                                # (batch, 1)


def init_params(key):
    """Deterministic init matching the PyTorch module's layer shapes.
    Weights stored as (out_features, in_features) (same as nn.Linear);
    biases as (out_features, 1) for lane-broadcast in the feature-major kernel."""
    dims = [(10, 50), (50, 20), (20, 1)]
    params = []
    for i, (din, dout) in enumerate(dims):
        kw, kb = jax.random.split(jax.random.fold_in(key, i))
        bound = 1.0 / jnp.sqrt(jnp.float32(din))  # PyTorch default uniform bound
        w = jax.random.uniform(kw, (dout, din), jnp.float32, -bound, bound)
        b = jax.random.uniform(kb, (dout, 1), jnp.float32, -bound, bound)
        params += [w, b]
    return tuple(params)


def reference_forward(x, params):
    w1, b1, w2, b2, w3, b3 = params
    h1 = jnp.maximum(x @ w1.T + b1.T, 0.0)
    h2 = jnp.maximum(h1 @ w2.T + b2.T, 0.0)
    return h2 @ w3.T + b3.T


if __name__ == "__main__":
    key = jax.random.PRNGKey(0)
    kx, kp = jax.random.split(key)
    params = init_params(kp)

    fwd = jax.jit(lambda xx: test_model_forward(xx, params))

    # Main small-shape check (batch not a multiple of the 128-lane tile -> exercises padding).
    batch = 8
    x = jax.random.normal(kx, (batch, 10), jnp.float32)
    out = jax.block_until_ready(fwd(x))
    ref = reference_forward(x, params)
    assert out.shape == (batch, 1), out.shape
    assert jnp.allclose(out, ref, atol=1e-5, rtol=1e-5), "mismatch vs reference (batch=8)"

    # Second check: batch spanning multiple lane groups / non-tile-multiple.
    batch2 = 200
    x2 = jax.random.normal(jax.random.fold_in(kx, 1), (batch2, 10), jnp.float32)
    out2 = jax.block_until_ready(fwd(x2))
    ref2 = reference_forward(x2, params)
    assert out2.shape == (batch2, 1), out2.shape
    assert jnp.allclose(out2, ref2, atol=1e-5, rtol=1e-5), "mismatch vs reference (batch=200)"

    print("KERNEL_OK")
</pallas_src>

<mosaic_0001>
module attributes {stable_mosaic.version = 11 : i64} {
  func.func @mlp_kernel(%arg0: i32, %arg1: memref<10x128xf32, #tpu.memory_space<vmem>>, %arg2: memref<50x10xf32, #tpu.memory_space<vmem>>, %arg3: memref<50x1xf32, #tpu.memory_space<vmem>>, %arg4: memref<20x50xf32, #tpu.memory_space<vmem>>, %arg5: memref<20x1xf32, #tpu.memory_space<vmem>>, %arg6: memref<1x20xf32, #tpu.memory_space<vmem>>, %arg7: memref<1x1xf32, #tpu.memory_space<vmem>>, %arg8: memref<1x128xf32, #tpu.memory_space<vmem>>) attributes {dimension_semantics = [#tpu.dimension_semantics<parallel>], iteration_bounds = array<i64: 1>, scalar_prefetch = 0 : i64, scratch_operands = 0 : i64, tpu.core_type = #tpu.core_type<tc>, window_params = [{transform_indices = @transform_0, window_bounds = array<i64: 10, 128>}, {pipeline_mode = #tpu.pipeline_mode<synchronous>, transform_indices = @transform_1, window_bounds = array<i64: 50, 10>}, {pipeline_mode = #tpu.pipeline_mode<synchronous>, transform_indices = @transform_2, window_bounds = array<i64: 50, 1>}, {pipeline_mode = #tpu.pipeline_mode<synchronous>, transform_indices = @transform_3, window_bounds = array<i64: 20, 50>}, {pipeline_mode = #tpu.pipeline_mode<synchronous>, transform_indices = @transform_4, window_bounds = array<i64: 20, 1>}, {pipeline_mode = #tpu.pipeline_mode<synchronous>, transform_indices = @transform_5, window_bounds = array<i64: 1, 20>}, {pipeline_mode = #tpu.pipeline_mode<synchronous>, transform_indices = @transform_6, window_bounds = array<i64: 1, 1>}, {transform_indices = @transform_7, window_bounds = array<i64: 1, 128>}]} {
    %c0 = arith.constant 0 : index
    %c0_0 = arith.constant 0 : index
    %0 = vector.load %arg1[%c0, %c0_0] : memref<10x128xf32, #tpu.memory_space<vmem>>, vector<10x128xf32>
    %c0_1 = arith.constant 0 : index
    %c0_2 = arith.constant 0 : index
    %1 = vector.load %arg2[%c0_1, %c0_2] : memref<50x10xf32, #tpu.memory_space<vmem>>, vector<50x10xf32>
    %cst = arith.constant dense<0.000000e+00> : vector<50x128xf32>
    %2 = tpu.matmul %1, %0, %cst {dimension_numbers = #tpu.dot_dimension_numbers<[1], [0], [0], [1], [0, 0, 1, 1], [], []>} : vector<50x10xf32>, vector<10x128xf32>, vector<50x128xf32> -> vector<50x128xf32>
    %c0_3 = arith.constant 0 : index
    %c0_4 = arith.constant 0 : index
    %3 = vector.load %arg3[%c0_3, %c0_4] : memref<50x1xf32, #tpu.memory_space<vmem>>, vector<50x1xf32>
    %4 = vector.broadcast %3 : vector<50x1xf32> to vector<50x128xf32>
    %5 = arith.addf %2, %4 : vector<50x128xf32>
    %cst_5 = arith.constant 0.000000e+00 : f32
    %6 = vector.broadcast %cst_5 : f32 to vector<50x128xf32>
    %7 = arith.maximumf %5, %6 : vector<50x128xf32>
    %c0_6 = arith.constant 0 : index
    %c0_7 = arith.constant 0 : index
    %8 = vector.load %arg4[%c0_6, %c0_7] : memref<20x50xf32, #tpu.memory_space<vmem>>, vector<20x50xf32>
    %cst_8 = arith.constant dense<0.000000e+00> : vector<20x128xf32>
    %9 = tpu.matmul %8, %7, %cst_8 {dimension_numbers = #tpu.dot_dimension_numbers<[1], [0], [0], [1], [0, 0, 1, 1], [], []>} : vector<20x50xf32>, vector<50x128xf32>, vector<20x128xf32> -> vector<20x128xf32>
    %c0_9 = arith.constant 0 : index
    %c0_10 = arith.constant 0 : index
    %10 = vector.load %arg5[%c0_9, %c0_10] : memref<20x1xf32, #tpu.memory_space<vmem>>, vector<20x1xf32>
    %11 = vector.broadcast %10 : vector<20x1xf32> to vector<20x128xf32>
    %12 = arith.addf %9, %11 : vector<20x128xf32>
    %cst_11 = arith.constant 0.000000e+00 : f32
    %13 = vector.broadcast %cst_11 : f32 to vector<20x128xf32>
    %14 = arith.maximumf %12, %13 : vector<20x128xf32>
    %c0_12 = arith.constant 0 : index
    %c0_13 = arith.constant 0 : index
    %15 = vector.load %arg6[%c0_12, %c0_13] : memref<1x20xf32, #tpu.memory_space<vmem>>, vector<1x20xf32>
    %cst_14 = arith.constant dense<0.000000e+00> : vector<1x128xf32>
    %16 = tpu.matmul %15, %14, %cst_14 {dimension_numbers = #tpu.dot_dimension_numbers<[1], [0], [0], [1], [0, 0, 1, 1], [], []>} : vector<1x20xf32>, vector<20x128xf32>, vector<1x128xf32> -> vector<1x128xf32>
    %c0_15 = arith.constant 0 : index
    %c0_16 = arith.constant 0 : index
    %17 = vector.load %arg7[%c0_15, %c0_16] : memref<1x1xf32, #tpu.memory_space<vmem>>, vector<1x1xf32>
    %18 = vector.broadcast %17 : vector<1x1xf32> to vector<1x128xf32>
    %19 = arith.addf %16, %18 : vector<1x128xf32>
    %c0_17 = arith.constant 0 : index
    %c0_18 = arith.constant 0 : index
    %20 = vector.load %arg8[%c0_17, %c0_18] : memref<1x128xf32, #tpu.memory_space<vmem>>, vector<1x128xf32>
    tpu.vector_store %arg8[%c0_17, %c0_18], %19 {strides = array<i32>} : memref<1x128xf32, #tpu.memory_space<vmem>>, vector<1x128xf32>,
    return
  }
  func.func @transform_0(%arg0: i32) -> (i32, i32) {
    %c0_i32 = arith.constant 0 : i32
    %c0_i32_0 = arith.constant 0 : i32
    return %c0_i32, %arg0 : i32, i32
  }
  func.func @transform_1(%arg0: i32) -> (i32, i32) {
    %c0_i32 = arith.constant 0 : i32
    %c0_i32_0 = arith.constant 0 : i32
    %c0_i32_1 = arith.constant 0 : i32
    return %c0_i32, %c0_i32_0 : i32, i32
  }
  func.func @transform_2(%arg0: i32) -> (i32, i32) {
    %c0_i32 = arith.constant 0 : i32
    %c0_i32_0 = arith.constant 0 : i32
    %c0_i32_1 = arith.constant 0 : i32
    return %c0_i32, %c0_i32_0 : i32, i32
  }
  func.func @transform_3(%arg0: i32) -> (i32, i32) {
    %c0_i32 = arith.constant 0 : i32
    %c0_i32_0 = arith.constant 0 : i32
    %c0_i32_1 = arith.constant 0 : i32
    return %c0_i32, %c0_i32_0 : i32, i32
  }
  func.func @transform_4(%arg0: i32) -> (i32, i32) {
    %c0_i32 = arith.constant 0 : i32
    %c0_i32_0 = arith.constant 0 : i32
    %c0_i32_1 = arith.constant 0 : i32
    return %c0_i32, %c0_i32_0 : i32, i32
  }
  func.func @transform_5(%arg0: i32) -> (i32, i32) {
    %c0_i32 = arith.constant 0 : i32
    %c0_i32_0 = arith.constant 0 : i32
    %c0_i32_1 = arith.constant 0 : i32
    return %c0_i32, %c0_i32_0 : i32, i32
  }
  func.func @transform_6(%arg0: i32) -> (i32, i32) {
    %c0_i32 = arith.constant 0 : i32
    %c0_i32_0 = arith.constant 0 : i32
    %c0_i32_1 = arith.constant 0 : i32
    return %c0_i32, %c0_i32_0 : i32, i32
  }
  func.func @transform_7(%arg0: i32) -> (i32, i32) {
    %c0_i32 = arith.constant 0 : i32
    %c0_i32_0 = arith.constant 0 : i32
    return %c0_i32, %arg0 : i32, i32
  }
}

</mosaic_0001>

<bundles_post_ra>
// kernel: _lambda_.1
= control target key start
LH: loop header
LB: loop body
LE: loop exit
PB: predicated region body
PF: predicated region fallthrough
CT: control target
= control target key end

     0   :  { %s834_s0 = inlined_call_operand.vmem [shape: f32[10,128], index: 0, kind: input, shape index: {}]   ;;  %s835_s1 = inlined_call_operand.hbm [shape: f32[50,10], index: 1, kind: input, shape index: {}]   ;;  %s836_s2 = inlined_call_operand.vmem [shape: f32[50,1], index: 2, kind: input, shape index: {}]   ;;  %s837_s3 = inlined_call_operand.hbm [shape: f32[20,50], index: 3, kind: input, shape index: {}]   ;;  %s838_s4 = inlined_call_operand.hbm [shape: f32[20,1], index: 4, kind: input, shape index: {}]   ;;  %s839_s5 = inlined_call_operand.vmem [shape: f32[1,20], index: 5, kind: input, shape index: {}]   ;;  %s840_s6 = inlined_call_operand.<no memory space> [shape: f32[1,1], index: 6, kind: input, shape index: {}]   ;;  %s841_s7 = inlined_call_operand.vmem [shape: f32[1,128], index: 7, kind: output, shape index: {}]  }
   0x1   :  { %v12_v0 = vstv %s840_s6 }
   0x2   :  { %13 = vst [vmem:[#allocation2] sm:$0x1] %v12_v0 }
   0x3   :  { %14 = vsyncpa [#allocation4], 0 }
   0x4   :  { %15 = vsyncpa [#allocation6], 0  ;;  %s658_s26 = smov [#allocation5]   ;;  %s659_s28 = smov [#allocation3]  }
   0x5   :  { %s37_s27 = sshll.u32 %s658_s26, 4  ;;  %s23_s29 = sshll.u32 %s659_s28, 4  ;;  %s38_s27 = int_to_ptr.vmem [resolvable:$true] %s37_s27  ;;  %s711_s29 = int_to_ptr.vmem [resolvable:$true] %s23_s29 }
   0x6   :  { %s588_s9 = scalar_lea.hbm %s837_s3, 384 }
   0x7   :  { %p589_p0 = scmp.ne.s32.totalorder %s837_s3, %s588_s9  ;;  %p592_p1 = scmp.lt.u32.totalorder %s588_s9, %s837_s3 }
   0x9   :  { %p594_p2 = pnand %p592_p1, %p589_p0 }
   0xb   :  { %597 = shalt.err (!%p594_p2)
}
   0xc   :  { %s598_s13 = scalar_lea.vmem %s38_s27, 384  ;;  %p603_p4 = scmp.lt.s32.totalorder %s38_s27, %s38_s27 }
   0xd   :  { %p599_p3 = scmp.ne.s32.totalorder %s38_s27, %s598_s13  ;;  %p604_p5 = scmp.lt.s32.totalorder %s598_s13, %s598_s13 }
   0xf   :  { %p605_p6 = por %p604_p5, %p603_p4 }
  0x11   :  { %p606_p7 = pnand %p605_p6, %p599_p3 }
  0x13   :  { %609 = shalt.err (!%p606_p7)
}
  0x14   :  { %s660_s14 = smov 128   ;;  %s661_s15 = smov 8  }
  0x15   :  { %43 = dma.hbm_to_vmem [thread:$0]  %s837_s3, 384, %s38_s27, [#allocation6], %s660_s14, %s660_s14, %s661_s15  }
  0x16   :  { %s610_s20 = scalar_lea.hbm %s835_s1, 896 }
  0x17   :  { %p611_p8 = scmp.ne.s32.totalorder %s835_s1, %s610_s20  ;;  %p614_p9 = scmp.lt.u32.totalorder %s610_s20, %s835_s1 }
  0x19   :  { %p616_p10 = pnand %p614_p9, %p611_p8 }
  0x1b   :  { %619 = shalt.err (!%p616_p10)
}
  0x1c   :  { %s620_s25 = scalar_lea.vmem %s711_s29, 896  ;;  %p625_p12 = scmp.lt.s32.totalorder %s711_s29, %s711_s29 }
  0x1d   :  { %p621_p11 = scmp.ne.s32.totalorder %s711_s29, %s620_s25  ;;  %p626_p13 = scmp.lt.s32.totalorder %s620_s25, %s620_s25 }
  0x1f   :  { %p627_p0 = por %p626_p13, %p625_p12 }
  0x21   :  { %p628_p1 = pnand %p627_p0, %p621_p11 }
  0x23   :  { %631 = shalt.err (!%p628_p1)
}
  0x24   :  { %29 = dma.hbm_to_vmem [thread:$0]  %s835_s1, 896, %s711_s29, [#allocation4], %s660_s14, %s660_s14, %s661_s15  }
  0x25   :  { %s662_s27 = smov [#allocation7]   ;;  %s632_s9 = scalar_lea.hbm %s838_s4, 384 }
  0x26   :  { %s49_s28 = sshll.u32 %s662_s27, 4  ;;  %p633_p2 = scmp.ne.s32.totalorder %s838_s4, %s632_s9  ;;  %s50_s28 = int_to_ptr.vmem [resolvable:$true] %s49_s28 }
  0x27   :  { %p636_p3 = scmp.lt.u32.totalorder %s632_s9, %s838_s4 }
  0x29   :  { %p638_p4 = pnand %p636_p3, %p633_p2 }
  0x2b   :  { %641 = shalt.err (!%p638_p4)
}
  0x2c   :  { %s642_s13 = scalar_lea.vmem %s50_s28, 384  ;;  %p647_p6 = scmp.lt.s32.totalorder %s50_s28, %s50_s28 }
  0x2d   :  { %p643_p5 = scmp.ne.s32.totalorder %s50_s28, %s642_s13  ;;  %p648_p7 = scmp.lt.s32.totalorder %s642_s13, %s642_s13 }
  0x2f   :  { %p649_p8 = por %p648_p7, %p647_p6 }
  0x31   :  { %p650_p9 = pnand %p649_p8, %p643_p5 }
  0x33   :  { %653 = shalt.err (!%p650_p9)
}
  0x34   :  { %55 = dma.hbm_to_vmem [thread:$0]  %s838_s4, 384, %s50_s28, [#allocation6], %s660_s14, %s660_s14, %s661_s15  }
  0x35   :  { %654 = dma.done.wait [#allocation4], 896  }
  0x36   :  { %655 = vsyncadd [#allocation4], 4294966400 }
  0x37   :  { %656 = dma.done.wait [#allocation6], 768  }
  0x38   :  { %657 = vsyncadd [#allocation6], 4294966528  ;;  %v663_v1 = vmov 0.0|0.0   ;;  %vm664_vm0 = vmmov 0   ;;  %v665_v2 = vmov 0.0   ;;  %v666_v3 = vmov 0  }
  0x39   :  { %560 = vmatprep.subr.bf16.mxu0 %v663_v1  ;;  %564 = vmatprep.subr.bf16.mxu1 %v663_v1  ;;  %vm142_vm1 = vcmask 1041408   ;;  %v69_v4 = vld [vmem:[%s834_s0] sm:$0xff]  ;;  %v70_v5 = vld [vmem:[%s834_s0 + $0x8] sm:$0x3]  ;;  %vm667_vm2 = vmmov 1   ;;  %vm120_vm4 = vcmask 80896  }
  0x3a   :  { %507 = vmatprep.mubr.msk.f32.mxu0 %vm664_vm0, %v665_v2  ;;  %586 = vset.pattern.permute.xlu0 %v666_v3  ;;  %vm562_vm3 = vmpackc.low %vm142_vm1, %vm667_vm2  ;;  %v561_v6 = vpack.c.bf16 %v70_v5, %v69_v4  ;;  %v71_v7 = vld [vmem:[#allocation3] sm:$0xff]  ;;  %v80_v9 = vld [vmem:[%s836_s2 + $0x10] sm:$0xff]  ;;  %vm274_vm5 = vcmask 408576   ;;  %vm385_vm6 = vcmask 1043456   ;;  %vm381_vm7 = vcmask 162816  }
  0x3b   :  { %587 = vset.pattern.permute.xlu1 %v666_v3  ;;  %542 = vmatprep.mubr.msk.f32.mxu1 %vm664_vm0, %v665_v2  ;;  %v78_v8 = vld [vmem:[%s836_s2] sm:$0xff]  ;;  %v79_v10 = vld [vmem:[%s836_s2 + $0x8] sm:$0xff]  ;;  %v81_v11 = vld [vmem:[%s836_s2 + $0x18] sm:$0xff] }
  0x3c   :  { %563 = vmatpush3.bf16.msk.msra.mxu0 %vm562_vm3, %v561_v6  ;;  %87 = vperm.xlu0 %586, %v78_v8   ;;  %v72_v12 = vld [vmem:[#allocation3 + $0x8] sm:$0xff]  ;;  %v73_v15 = vld [vmem:[#allocation3 + $0x10] sm:$0xff]  ;;  %v74_v18 = vld [vmem:[#allocation3 + $0x18] sm:$0xff] }
  0x3d   :  { %97 = vperm.xlu1 %587, %v80_v9   ;;  %v82_v13 = vld [vmem:[%s836_s2 + $0x20] sm:$0xff]  ;;  %v83_v14 = vld [vmem:[%s836_s2 + $0x28] sm:$0xff]  ;;  %v84_v16 = vld [vmem:[%s836_s2 + $0x30] sm:$0x3] }
  0x3e   :  { %v256_v17 = vld [vmem:[#allocation7] sm:$0xff]  ;;  %v257_v19 = vld [vmem:[#allocation7 + $0x8] sm:$0xff]  ;;  %v258_v20 = vld [vmem:[#allocation7 + $0x10] sm:$0xf] }
  0x3f   :  { %508 = vmatmul.mubr.msk.f32.vlgmr.msra.gmra.mrb[0].mxu0 %vm120_vm4, %v71_v7  ;;  %v75_v21 = vld [vmem:[#allocation3 + $0x20] sm:$0xff]  ;;  %v371_v22 = vld [vmem:[#allocation2] sm:$0x1]  ;;  %v76_v23 = vld [vmem:[#allocation3 + $0x28] sm:$0xff] }
  0x40   :  { %510 = vmatprep.mubr.msk.f32.mxu0 %vm664_vm0, %v665_v2  ;;  %92 = vperm.xlu0 %586, %v79_v10   ;;  %v77_v24 = vld [vmem:[#allocation3 + $0x30] sm:$0x3]  ;;  %v253_v63 = vld [vmem:[#allocation5] sm:$0xff]  ;;  %v254_v0 = vld [vmem:[#allocation5 + $0x8] sm:$0xff] }
  0x41   :  { %102 = vperm.xlu1 %587, %v81_v11   ;;  %v255_v3 = vld [vmem:[#allocation5 + $0x10] sm:$0xf] }
  0x43   :  { %511 = vmatmul.mubr.msk.f32.gmra.mrb[2].mxu0 %vm120_vm4, %v72_v12 }
  0x44   :  { %513 = vmatprep.mubr.msk.f32.mxu0 %vm664_vm0, %v665_v2  ;;  %107 = vperm.xlu0 %586, %v82_v13  }
  0x45   :  { %112 = vperm.xlu1 %587, %v83_v14  }
  0x47   :  { %514 = vmatmul.mubr.msk.f32.gmra.mrb[4].mxu0 %vm120_vm4, %v73_v15 }
  0x48   :  { %516 = vmatprep.mubr.msk.f32.mxu0 %vm664_vm0, %v665_v2  ;;  %117 = vperm.xlu0 %586, %v84_v16  }
  0x49   :  { %261 = vperm.xlu1 %587, %v256_v17  }
  0x4b   :  { %517 = vmatmul.mubr.msk.f32.gmra.mrb[6].mxu0 %vm120_vm4, %v74_v18 }
  0x4c   :  { %519 = vmatprep.mubr.msk.f32.mxu0 %vm664_vm0, %v665_v2  ;;  %266 = vperm.xlu0 %586, %v257_v19   ;;  %v370_v19 = vld [vmem:[%s839_s5] sm:$0x1] }
  0x4d   :  { %271 = vperm.xlu1 %587, %v258_v20   ;;  %v377_v20 = vlaneseq }
  0x4f   :  { %520 = vmatmul.mubr.msk.f32.gmra.mrb[8].mxu0 %vm120_vm4, %v75_v21  ;;  %v378_v21 = vshrl.u32 %v377_v20, 7 }
  0x50   :  { %522 = vmatprep.mubr.msk.f32.mxu0 %vm664_vm0, %v665_v2  ;;  %374 = vperm.xlu0 %586, %v371_v22  }
  0x51   :  { %v379_v22 = vsub.s32 0, %v378_v21 }
  0x53   :  { %523 = vmatmul.mubr.msk.f32.gmra.mrb[10].mxu0 %vm120_vm4, %v76_v23 }
  0x54   :  { %525 = vmatprep.mubr.msk.f32.mxu0 %vm664_vm0, %v665_v2 }
  0x57   :  { %526 = vmatmul.mubr.msk.f32.gmra.mrb[12].mxu0 %vm120_vm4, %v77_v24 }
  0xbb   :  { %v88_v25 = vpop.permute.xlu0 %87 }
  0xbc   :  { %v98_v33 = vpop.permute.xlu1 %97 }
  0xbf   :  { %v93_v29 = vpop.permute.xlu0 %92 }
  0xc0   :  { %v103_v40 = vpop.permute.xlu1 %102 }
  0xc3   :  { %v108_v49 = vpop.permute.xlu0 %107 }
  0xc4   :  { %v113_v51 = vpop.permute.xlu1 %112 }
  0xc7   :  { %v118_v57 = vpop.permute.xlu0 %117 }
  0xc8   :  { %v262_v6 = vpop.permute.xlu1 %261 }
  0xcb   :  { %v267_v8 = vpop.permute.xlu0 %266 }
  0xcc   :  { %v272_v13 = vpop.permute.xlu1 %271 }
  0xcf   :  { %v375_v23 = vpop.permute.xlu0 %374 }
  0xd0   :  { %v380_v24 = vrot.slane %v375_v23, %v379_v22 }
 0x112   :  { %v212_v26 = vpop.f32.mrb[0].mxu0 }
 0x113   :  { %v509_v27 = vpop.f32.mrb[1].mxu0  ;;  %v213_v28 = vadd.f32 %v212_v26, %v88_v25 }
 0x115   :  { %v246_v34 = vmax.f32 %v213_v28, 0.0 }
 0x116   :  { %v217_v30 = vpop.f32.mrb[2].mxu0 }
 0x117   :  { %v218_v31 = vadd.f32 %v217_v30, %v93_v29  ;;  %v512_v32 = vpop.f32.mrb[3].mxu0 }
 0x119   :  { %v247_v35 = vmax.f32 %v218_v31, 0.0 }
 0x11a   :  { %v222_v36 = vpop.f32.mrb[4].mxu0 }
 0x11b   :  { %v515_v37 = vpop.f32.mrb[5].mxu0  ;;  %v565_v38 = vpack.c.bf16 %v247_v35, %v246_v34  ;;  %v223_v39 = vadd.f32 %v222_v36, %v98_v33 }
 0x11d   :  { %566 = vmatpush3.bf16.msra.mxu1 %v565_v38  ;;  %v248_v44 = vmax.f32 %v223_v39, 0.0 }
 0x11e   :  { %v227_v41 = vpop.f32.mrb[6].mxu0  ;;  %567 = vmatprep.subr.bf16.mxu1 %v663_v1 }
 0x11f   :  { %v228_v42 = vadd.f32 %v227_v41, %v103_v40  ;;  %v518_v43 = vpop.f32.mrb[7].mxu0 }
 0x121   :  { %v249_v45 = vmax.f32 %v228_v42, 0.0 }
 0x122   :  { %v232_v46 = vpop.f32.mrb[8].mxu0 }
 0x123   :  { %v568_v47 = vpack.c.bf16 %v249_v45, %v248_v44  ;;  %v521_v48 = vpop.f32.mrb[9].mxu0  ;;  %v233_v50 = vadd.f32 %v232_v46, %v108_v49 }
 0x125   :  { %569 = vmatpush3.bf16.msra.mxu1 %v568_v47  ;;  %v250_v55 = vmax.f32 %v233_v50, 0.0 }
 0x126   :  { %v237_v52 = vpop.f32.mrb[10].mxu0  ;;  %570 = vmatprep.subr.bf16.mxu1 %v663_v1 }
 0x127   :  { %v238_v53 = vadd.f32 %v237_v52, %v113_v51  ;;  %v524_v54 = vpop.f32.mrb[11].mxu0 }
 0x129   :  { %v251_v56 = vmax.f32 %v238_v53, 0.0 }
 0x12a   :  { %v242_v58 = vpop.f32.mrb[12].mxu0 }
 0x12b   :  { %v571_v59 = vpack.c.bf16 %v251_v56, %v250_v55  ;;  %v243_v60 = vadd.f32 %v242_v58, %v118_v57  ;;  %v527_v61 = vpop.f32.mrb[13].mxu0 }
 0x12d   :  { %572 = vmatpush3.bf16.msra.mxu1 %v571_v59  ;;  %v252_v62 = vmax.f32 %v243_v60, 0.0 }
 0x12e   :  { %540 = vmatprep.subr.mxu1 %v665_v2 }
 0x131   :  { %541 = vmatpush3.msk.msra.mxu1 %vm142_vm1, %v252_v62 }
 0x132   :  { %543 = vmatmul.mubr.msk.f32.vlgmr.msra.gmra.mrb[0].mxu1 %vm274_vm5, %v253_v63  ;;  %573 = vmatprep.subr.bf16.mxu1 %v663_v1 }
 0x133   :  { %545 = vmatprep.mubr.msk.f32.mxu1 %vm664_vm0, %v665_v2 }
 0x136   :  { %546 = vmatmul.mubr.msk.f32.gmra.mrb[2].mxu1 %vm274_vm5, %v254_v0 }
 0x137   :  { %548 = vmatprep.mubr.msk.f32.mxu1 %vm664_vm0, %v665_v2 }
 0x13a   :  { %549 = vmatmul.mubr.msk.f32.gmra.mrb[4].mxu1 %vm274_vm5, %v255_v3 }
 0x13b   :  { %557 = vmatprep.mubr.msk.f32.mxu1 %vm664_vm0, %v665_v2 }
 0x205   :  { %v353_v4 = vpop.f32.mrb[0].mxu1 }
 0x206   :  { %v544_v5 = vpop.f32.mrb[1].mxu1  ;;  %v354_v7 = vadd.f32 %v353_v4, %v262_v6 }
 0x208   :  { %v367_v11 = vmax.f32 %v354_v7, 0.0 }
 0x209   :  { %v358_v9 = vpop.f32.mrb[2].mxu1 }
 0x20a   :  { %v359_v1 = vadd.f32 %v358_v9, %v267_v8  ;;  %v547_v10 = vpop.f32.mrb[3].mxu1 }
 0x20c   :  { %v368_v12 = vmax.f32 %v359_v1, 0.0 }
 0x20d   :  { %v363_v14 = vpop.f32.mrb[4].mxu1 }
 0x20e   :  { %v574_v15 = vpack.c.bf16 %v368_v12, %v367_v11  ;;  %v364_v16 = vadd.f32 %v363_v14, %v272_v13  ;;  %v550_v17 = vpop.f32.mrb[5].mxu1 }
 0x210   :  { %575 = vmatpush3.bf16.msra.mxu1 %v574_v15  ;;  %v369_v18 = vmax.f32 %v364_v16, 0.0 }
 0x211   :  { %555 = vmatprep.subr.mxu1 %v665_v2 }
 0x214   :  { %556 = vmatpush3.msk.msra.mxu1 %vm385_vm6, %v369_v18 }
 0x215   :  { %558 = vmatmul.mubr.msk.f32.vlgmr.msra.gmra.mrb[6].mxu1 %vm381_vm7, %v370_v19 }
 0x2e8   :  { %v455_v25 = vpop.f32.mrb[6].mxu1 }
 0x2e9   :  { %v456_v26 = vadd.f32 %v455_v25, %v380_v24  ;;  %v559_v27 = vpop.f32.mrb[7].mxu1 }
 0x2eb   :  { %459 = vst [vmem:[%s841_s7] sm:$0x1] %v456_v26 }
 0x2ec   :  { %464 = vsyncpa [#allocation4], 1 }
 0x2ed   :  { %465 = vsyncpa [#allocation6], 1 }

</bundles_post_ra>
